<compile_context>
chip_gen: v7x
topology: tpu7x:2x2x1
jax: 0.10.0
libtpu: 0.0.40
codegen_flags: <defaults>
</compile_context>

<pallas_src>
import jax
import jax.numpy as jnp
from jax.experimental import pallas as pl
from jax.experimental.pallas import tpu as pltpu

_SCALE = 1.0 / 127.5
_SHIFT = 1.0
_LANE = 128
_MAX_WIDTH = 8192                      # 64 * 128 lanes
_TARGET_BLOCK_BYTES = 2 * 1024 * 1024  # ~2 MiB output block
_TINY_ELEMS = 1 << 16                  # below this, Pallas dispatch overhead dominates


def _lambda_kernel(x_ref, o_ref):
    # elementwise: x / 127.5 - 1.0  (cast done in-kernel so integer inputs
    # move 1/4 the HBM read bytes of a pre-cast f32 slab)
    x = x_ref[...].astype(jnp.float32)
    o_ref[...] = (x * jnp.float32(_SCALE) - jnp.float32(_SHIFT)).astype(o_ref.dtype)


def _choose_width(total):
    """Largest lane-dense last-dim (multiple of 128, <= 8192) dividing total."""
    w = _MAX_WIDTH
    while w > _LANE and total % w != 0:
        w //= 2
    return w


def _choose_block_rows(rows, width, in_itemsize, out_itemsize):
    """Block rows giving ~2 MiB output blocks, respecting sublane packing."""
    br = max(1, _TARGET_BLOCK_BYTES // (width * out_itemsize))
    if br >= rows:
        return rows  # full-extent block along rows is always legal
    # sublane multiple: 8 for 32-bit, 16 for 16-bit, 32 for 8-bit dtypes
    sub = max(8 * (4 // in_itemsize), 8 * (4 // out_itemsize))
    br = max(sub, (br // sub) * sub)
    return min(br, rows)


def lambda_forward(x, force_pallas=False):
    """Lambda(lambda x: x / 127.5 - 1.0) via a Pallas TPU kernel.

    Accepts any shape/dtype.  Always returns a floating-point array (float32
    unless the input is already a floating dtype), matching the PyTorch
    semantics of `x / 127.5 - 1.0`.
    """
    orig_shape = x.shape
    out_dtype = x.dtype if jnp.issubdtype(x.dtype, jnp.floating) else jnp.float32
    total = x.size

    # Tiny or lane-ragged inputs: a standalone kernel dispatch + extra HBM
    # round trip costs more than the 2 VALU ops; let XLA fuse it instead.
    if total % _LANE != 0 or (total < _TINY_ELEMS and not force_pallas):
        # TODO(synk): ragged tails could use a masked pltpu.store path, but
        # modeld camera/feature tensors are always 128-aligned in practice.
        return (x.astype(jnp.float32) * _SCALE - _SHIFT).astype(out_dtype)

    # Lane-dense wide slab; no padding, no wrapper-side dtype pass.
    width = _choose_width(total)
    rows = total // width
    slab = x.reshape(rows, width)

    in_item = slab.dtype.itemsize
    out_item = jnp.dtype(out_dtype).itemsize
    br = _choose_block_rows(rows, width, in_item, out_item)
    grid = (pl.cdiv(rows, br),)

    cost = pl.CostEstimate(
        flops=2 * total,
        transcendentals=0,
        bytes_accessed=total * in_item + total * out_item,
    )

    out = pl.pallas_call(
        _lambda_kernel,
        out_shape=jax.ShapeDtypeStruct((rows, width), out_dtype),
        grid_spec=pltpu.PrefetchScalarGridSpec(
            num_scalar_prefetch=0,
            grid=grid,
            in_specs=[pl.BlockSpec((br, width), lambda i: (i, 0))],
            out_specs=pl.BlockSpec((br, width), lambda i: (i, 0)),
        ),
        compiler_params=pltpu.CompilerParams(
            dimension_semantics=("parallel",),  # shard grid across TCs (v7x)
        ),
        cost_estimate=cost,
    )(slab)

    return out.reshape(orig_shape)


if __name__ == "__main__":
    key_small, key_big = jax.random.split(jax.random.PRNGKey(0))

    # Small NCHW input consistent with the module: batch=2, channels=4, 16x16.
    x_small = jax.random.uniform(key_small, (2, 4, 16, 16), dtype=jnp.float32,
                                 minval=0.0, maxval=255.0)
    y_small = jax.block_until_ready(lambda_forward(x_small, force_pallas=True))
    ref_small = x_small / 127.5 - 1.0
    assert y_small.shape == x_small.shape and y_small.dtype == jnp.float32
    assert jnp.allclose(y_small, ref_small, atol=1e-6, rtol=1e-6)

    # Larger input that exercises the wide-block multi-step tiling path.
    x_big = jax.random.uniform(key_big, (2, 12, 128, 256), dtype=jnp.float32,
                               minval=0.0, maxval=255.0)
    y_big = jax.block_until_ready(lambda_forward(x_big))
    ref_big = x_big / 127.5 - 1.0
    assert y_big.shape == x_big.shape and y_big.dtype == jnp.float32
    assert jnp.allclose(y_big, ref_big, atol=1e-6, rtol=1e-6)

    print("KERNEL_OK")
</pallas_src>

<mosaic_0001>
module attributes {stable_mosaic.version = 11 : i64} {
  func.func @_lambda_kernel(%arg0: i32, %arg1: memref<1x2048xf32, #tpu.memory_space<vmem>>, %arg2: memref<1x2048xf32, #tpu.memory_space<vmem>>) attributes {dimension_semantics = [#tpu.dimension_semantics<parallel>], iteration_bounds = array<i64: 1>, scalar_prefetch = 0 : i64, scratch_operands = 0 : i64, tpu.core_type = #tpu.core_type<tc>, window_params = [{transform_indices = @transform_0, window_bounds = array<i64: 1, 2048>}, {transform_indices = @transform_1, window_bounds = array<i64: 1, 2048>}]} {
    %c0 = arith.constant 0 : index
    %c0_0 = arith.constant 0 : index
    %0 = vector.load %arg1[%c0, %c0_0] : memref<1x2048xf32, #tpu.memory_space<vmem>>, vector<1x2048xf32>
    %cst = arith.constant 0.00784313772 : f32
    %1 = vector.broadcast %cst : f32 to vector<1x2048xf32>
    %2 = arith.mulf %0, %1 : vector<1x2048xf32>
    %cst_1 = arith.constant 1.000000e+00 : f32
    %3 = vector.broadcast %cst_1 : f32 to vector<1x2048xf32>
    %4 = arith.subf %2, %3 : vector<1x2048xf32>
    %c0_2 = arith.constant 0 : index
    %c0_3 = arith.constant 0 : index
    %5 = vector.load %arg2[%c0_2, %c0_3] : memref<1x2048xf32, #tpu.memory_space<vmem>>, vector<1x2048xf32>
    tpu.vector_store %arg2[%c0_2, %c0_3], %4 {strides = array<i32>} : memref<1x2048xf32, #tpu.memory_space<vmem>>, vector<1x2048xf32>,
    return
  }
  func.func @transform_0(%arg0: i32) -> (i32, i32) {
    %c0_i32 = arith.constant 0 : i32
    %c0_i32_0 = arith.constant 0 : i32
    return %arg0, %c0_i32 : i32, i32
  }
  func.func @transform_1(%arg0: i32) -> (i32, i32) {
    %c0_i32 = arith.constant 0 : i32
    %c0_i32_0 = arith.constant 0 : i32
    return %arg0, %c0_i32 : i32, i32
  }
}

</mosaic_0001>

<bundles_post_ra>
// kernel: tpu_custom_call.1
= control target key start
LH: loop header
LB: loop body
LE: loop exit
PB: predicated region body
PF: predicated region fallthrough
CT: control target
= control target key end

     0   :  { %6 = vsyncpa [#allocation3], 0  ;;  %s132_s0 = inlined_call_operand.hbm [shape: f32[1,2048], index: 0, kind: input, shape index: {}]   ;;  %s133_s1 = inlined_call_operand.hbm [shape: f32[1,2048], index: 1, kind: output, shape index: {}]  }
   0x1   :  { %7 = vsyncpa [#allocation4], 0  ;;  %s96_s6 = smov [#allocation2]   ;;  %s48_s10 = scalar_lea.hbm %s132_s0, 256 }
   0x2   :  { %s14_s7 = sshll.u32 %s96_s6, 4  ;;  %p49_p0 = scmp.ne.s32.totalorder %s132_s0, %s48_s10  ;;  %s15_s7 = int_to_ptr.vmem [resolvable:$true] %s14_s7 }
   0x3   :  { %p52_p1 = scmp.lt.u32.totalorder %s48_s10, %s132_s0 }
   0x5   :  { %p54_p2 = pnand %p52_p1, %p49_p0 }
   0x7   :  { %57 = shalt.err (!%p54_p2)
}
   0x8   :  { %s58_s15 = scalar_lea.vmem %s15_s7, 256  ;;  %p63_p4 = scmp.lt.s32.totalorder %s15_s7, %s15_s7 }
   0x9   :  { %p59_p3 = scmp.ne.s32.totalorder %s15_s7, %s58_s15  ;;  %p64_p5 = scmp.lt.s32.totalorder %s58_s15, %s58_s15 }
   0xb   :  { %p65_p6 = por %p64_p5, %p63_p4 }
   0xd   :  { %p66_p7 = pnand %p65_p6, %p59_p3 }
   0xf   :  { %69 = shalt.err (!%p66_p7)
}
  0x10   :  { %17 = dma.hbm_to_vmem [thread:$0]  %s132_s0, 256, %s15_s7, [#allocation3]  }
  0x11   :  { %92 = dma.done.wait [#allocation3], 256  }
  0x12   :  { %93 = vsyncadd [#allocation3], 4294967040  ;;  %v21_v0 = vld [vmem:[#allocation2] sm:$0xff]  ;;  %v22_v1 = vld [vmem:[#allocation2 + $0x8] sm:$0xff]  ;;  %s97_s18 = smov [#allocation5]  }
  0x13   :  { %s35_s19 = sshll.u32 %s97_s18, 4  ;;  %v23_v2 = vmul.f32 0.007843138, %v21_v0  ;;  %v24_v3 = vmul.f32 0.007843138, %v22_v1  ;;  %s36_s19 = int_to_ptr.vmem [resolvable:$true] %s35_s19 }
  0x14   :  { %s70_s20 = scalar_lea.vmem %s36_s19, 256  ;;  %p75_p9 = scmp.lt.s32.totalorder %s36_s19, %s36_s19 }
  0x15   :  { %v44_v4 = vadd.f32 -1.0, %v23_v2  ;;  %v45_v5 = vadd.f32 -1.0, %v24_v3  ;;  %p71_p8 = scmp.ne.s32.totalorder %s36_s19, %s70_s20  ;;  %p76_p10 = scmp.lt.s32.totalorder %s70_s20, %s70_s20 }
  0x17   :  { %27 = vst [vmem:[#allocation5] sm:$0xff] %v44_v4  ;;  %28 = vst [vmem:[#allocation5 + $0x8] sm:$0xff] %v45_v5  ;;  %p77_p11 = por %p76_p10, %p75_p9 }
  0x19   :  { %p78_p12 = pnand %p77_p11, %p71_p8 }
  0x1b   :  { %81 = shalt.err (!%p78_p12)
}
  0x1c   :  { %s82_s22 = scalar_lea.hbm %s133_s1, 256 }
  0x1d   :  { %p83_p13 = scmp.ne.s32.totalorder %s133_s1, %s82_s22  ;;  %p86_p0 = scmp.lt.u32.totalorder %s82_s22, %s133_s1 }
  0x1f   :  { %p88_p1 = pnand %p86_p0, %p83_p13 }
  0x21   :  { %91 = shalt.err (!%p88_p1)
}
  0x22   :  { %38 = dma.vmem_to_hbm [thread:$0]  %s36_s19, 256, %s133_s1, [#allocation4]  }
  0x23   :  { %94 = dma.done.wait [#allocation4], 256  }
  0x24   :  { %95 = vsyncadd [#allocation4], 4294967040 }
  0x25   :  { %42 = vsyncpa [#allocation3], 1 }
  0x26   :  { %43 = vsyncpa [#allocation4], 1 }

</bundles_post_ra>
